<compile_context>
chip_gen: v7x
topology: tpu7x:2x2x1
jax: 0.10.0
libtpu: 0.0.40
codegen_flags: <defaults>
</compile_context>

<pallas_src>
import numpy as np
import jax
import jax.numpy as jnp
from jax.experimental import pallas as pl
from jax.experimental.pallas import tpu as pltpu


# ----------------------------------------------------------------------------
# Host-side precompute (numpy), mirroring Cube2Equi._config().
# ----------------------------------------------------------------------------
def build_cube2equi_tables(w, tile_n=128, k_blk=128):
    """Builds face-grouped, row-sorted, K-banded bilinear resample tables.

    Returns:
      M_banded : [n_tiles, K_band, tile_n] f32 — banded bilinear weights; row r
                 of tile t is source pixel kbase[t]*k_blk + r of face
                 face_id[t] (flattened w*w, row-major).
      face_id  : [n_tiles] int32 — source cube face of every column tile.
      kbase    : [n_tiles] int32 — K-block (size k_blk) base of every tile.
      col_idx  : [H*W] int32 — padded column holding each ERP pixel.
      (H, W)   : ERP output size (2w, 4w).
      k_blk    : K block size actually used.
    """
    H, W = 2 * w, 4 * w
    K = w * w
    if K % k_blk != 0:            # keep K-blocking only when it tiles exactly
        k_blk = K

    # TODO(synk): xy2angle / to_3dsphere / get_face / face_to_cube_coord /
    # norm_to_cube are FANet-repo helpers that are not available here; standard
    # equirectangular + cubemap conventions are used instead.  The bilinear
    # grid_sample(align_corners=True) structure of the module is preserved
    # exactly, but the face ordering/orientation may differ from the original.
    jj, ii = np.meshgrid(np.arange(W), np.arange(H))
    theta = (jj + 0.5) / W * 2.0 * np.pi - np.pi          # longitude
    phi = np.pi / 2.0 - (ii + 0.5) / H * np.pi            # latitude
    x = np.cos(phi) * np.cos(theta)
    y = np.cos(phi) * np.sin(theta)
    z = np.sin(phi)
    ax, ay, az = np.abs(x), np.abs(y), np.abs(z)

    # Face by dominant axis: 0:+x 1:-x 2:+y 3:-y 4:+z 5:-z
    face = np.empty((H, W), np.int64)
    cx = (ax >= ay) & (ax >= az)
    cy = (~cx) & (ay >= az)
    cz = (~cx) & (~cy)
    face[cx & (x >= 0)] = 0
    face[cx & (x < 0)] = 1
    face[cy & (y >= 0)] = 2
    face[cy & (y < 0)] = 3
    face[cz & (z >= 0)] = 4
    face[cz & (z < 0)] = 5

    sel = [face == f for f in range(6)]
    maj = np.select(sel, [ax, ax, ay, ay, az, az])        # >= 1/sqrt(3) > 0
    u = np.select(sel, [-y, y, x, -x, y, y]) / maj        # in-face coords [-1,1]
    v = np.select(sel, [-z, -z, -z, -z, x, -x]) / maj

    # align_corners=True: grid value -1 -> pixel 0, +1 -> pixel w-1
    xf = np.clip((u + 1.0) * 0.5 * (w - 1), 0.0, w - 1.0)
    yf = np.clip((v + 1.0) * 0.5 * (w - 1), 0.0, w - 1.0)
    x0 = np.floor(xf).astype(np.int64)
    x1 = np.minimum(x0 + 1, w - 1)
    y0 = np.floor(yf).astype(np.int64)
    y1 = np.minimum(y0 + 1, w - 1)
    wx, wy = xf - x0, yf - y0

    facef = face.ravel()
    x0, x1, y0, y1 = x0.ravel(), x1.ravel(), y0.ravel(), y1.ravel()
    wx, wy = wx.ravel(), wy.ravel()
    HW = H * W

    # Group ERP pixels by face and sort by source row y0 (then x0) so each
    # 128-wide tile's 4 bilinear taps touch a narrow band of source rows.
    tiles = []                                  # (face, ERP pixel indices)
    col_idx = np.zeros((HW,), np.int32)
    col = 0
    for f in range(6):
        pix = np.nonzero(facef == f)[0]
        pix = pix[np.lexsort((x0[pix], y0[pix]))]
        n = pix.size
        n_t = (n + tile_n - 1) // tile_n
        for t in range(n_t):
            tiles.append((f, pix[t * tile_n:(t + 1) * tile_n]))
        col_idx[pix] = (col + np.arange(n)).astype(np.int32)
        col += n_t * tile_n

    n_tiles = len(tiles)
    face_id = np.array([f for f, _ in tiles], np.int32)

    # Per-tile source-row band -> aligned K-block base + common band height.
    k_blocks = K // k_blk
    ks = np.zeros((n_tiles,), np.int64)
    ke = np.zeros((n_tiles,), np.int64)
    for t, (_, sub) in enumerate(tiles):
        ks[t] = y0[sub].min() * w
        ke[t] = (y1[sub].max() + 1) * w
    blocks_t = (ke + k_blk - 1) // k_blk - ks // k_blk
    n_kblk = int(max(1, blocks_t.max()))
    kbase = np.minimum(ks // k_blk, k_blocks - n_kblk)
    kbase = np.maximum(kbase, 0).astype(np.int32)
    K_band = n_kblk * k_blk

    M_banded = np.zeros((n_tiles, K_band, tile_n), np.float32)
    taps = ((y0, x0, (1.0 - wy) * (1.0 - wx)),
            (y0, x1, (1.0 - wy) * wx),
            (y1, x0, wy * (1.0 - wx)),
            (y1, x1, wy * wx))
    for t, (_, sub) in enumerate(tiles):
        cols = np.arange(sub.size)
        base = int(kbase[t]) * k_blk
        for yy, xx, ww_ in taps:
            src = yy[sub] * w + xx[sub] - base            # row within the band
            np.add.at(M_banded[t], (src, cols), ww_[sub].astype(np.float32))
    return M_banded, face_id, kbase, col_idx, (H, W), k_blk


# ----------------------------------------------------------------------------
# Pallas kernel: per-face, K-banded block matmul with a K-axis accumulator.
# ----------------------------------------------------------------------------
def _c2e_kernel(face_id_ref, kbase_ref, cube_ref, m_ref, o_ref, acc_ref):
    # face_id_ref / kbase_ref : SMEM scalar-prefetch tables (index_maps only)
    # cube_ref : [1, BC, k_blk]    bf16 — K block of this tile's source face
    # m_ref    : [1, k_blk, tile_n] bf16 — banded bilinear weights
    # o_ref    : [BC, tile_n] f32;  acc_ref : [BC, tile_n] f32 VMEM accumulator
    del face_id_ref, kbase_ref
    k = pl.program_id(1)

    @pl.when(k == 0)
    def _():
        acc_ref[...] = jnp.zeros_like(acc_ref)

    acc_ref[...] += jnp.dot(cube_ref[0], m_ref[0],
                            preferred_element_type=jnp.float32)

    @pl.when(k == pl.num_programs(1) - 1)
    def _():
        o_ref[...] = acc_ref[...]


def cube_to_equi_padded(cube_faces, M_banded, face_id, kbase, *, k_blk):
    """cube_faces: [6, BC, K] bf16; M_banded: [n_tiles, K_band, tile_n] bf16
    -> face-grouped padded output [BC, n_tiles*tile_n] f32."""
    n_faces, BC, K = cube_faces.shape
    n_tiles, K_band, tile_n = M_banded.shape
    assert n_faces == 6 and K % k_blk == 0 and K_band % k_blk == 0
    n_kblk = K_band // k_blk
    total_cols = n_tiles * tile_n

    # Explicit VMEM budget (scoped default differs per generation: 16 MiB v5e,
    # 32 MiB v6e/v7x; v7x has only 64 MiB physical, so stay well under 48 MiB).
    lhs_b = BC * k_blk * 2
    m_b = k_blk * tile_n * 2
    out_b = BC * tile_n * 4
    need = 2 * (lhs_b + m_b) + 3 * out_b + (1 << 20)
    vmem_limit = int(min(max(4 * need, 16 << 20), 48 << 20))

    # TODO(synk): pipeline_mode=pl.Buffered(3) on the weight stream and
    # tile_n in {256, 512} are worthwhile knobs once w (and B*C) grow.
    return pl.pallas_call(
        _c2e_kernel,
        out_shape=jax.ShapeDtypeStruct((BC, total_cols), jnp.float32),
        grid_spec=pltpu.PrefetchScalarGridSpec(
            num_scalar_prefetch=2,
            grid=(n_tiles, n_kblk),                 # reduction (K) axis last
            in_specs=[
                # LHS: k-th K block of this tile's band of its source face.
                pl.BlockSpec((1, BC, k_blk),
                             lambda t, k, fid, kb: (fid[t], 0, kb[t] + k)),
                # RHS: banded bf16 weights, lane-dense 128-column tile.
                pl.BlockSpec((1, k_blk, tile_n),
                             lambda t, k, fid, kb: (t, k, 0)),
            ],
            out_specs=pl.BlockSpec((BC, tile_n),
                                   lambda t, k, fid, kb: (0, t)),
            scratch_shapes=[pltpu.VMEM((BC, tile_n), jnp.float32)]),
        compiler_params=pltpu.CompilerParams(
            dimension_semantics=("parallel", "arbitrary"),
            vmem_limit_bytes=vmem_limit),
    )(face_id, kbase, cube_faces, M_banded)


# ----------------------------------------------------------------------------
# Public forward wrapper (PyTorch convention: input [B, 6, C, w, w]).
# ----------------------------------------------------------------------------
def cube2equi_forward(input_data, M_banded, face_id, kbase, col_idx, *,
                      out_hw, k_blk):
    B, n_faces, C, h, w = input_data.shape
    assert n_faces == 6 and h == w
    H, W = out_hw
    # [B, 6, C, h, w] -> [6, B*C, h*w]; cast to bf16 so the MXU is fed bf16
    # directly (no in-kernel widening).
    # TODO(synk): batching more (B*C) rows per call (>=64) amortizes the
    # weight-matrix HBM traffic further; shapes here follow the small demo.
    cube = jnp.transpose(input_data, (1, 0, 2, 3, 4))
    cube = cube.reshape(6, B * C, h * w).astype(jnp.bfloat16)
    out_padded = cube_to_equi_padded(cube, M_banded, face_id, kbase,
                                     k_blk=k_blk)
    erp = jnp.take(out_padded, col_idx, axis=1)   # un-permute to ERP order
    return erp.reshape(B, C, H, W)


if __name__ == "__main__":
    B, C, w = 2, 4, 16
    tile_n = 128   # at w=16 larger tiles only add per-face padding waste
    key = jax.random.PRNGKey(0)
    input_data = jax.random.normal(key, (B, 6, C, w, w), jnp.float32)

    (M_np, face_id_np, kbase_np, col_idx_np, (H, W), k_blk) = \
        build_cube2equi_tables(w, tile_n=tile_n, k_blk=128)
    M_banded = jnp.asarray(M_np, dtype=jnp.bfloat16)   # bf16 weight stream
    face_id = jnp.asarray(face_id_np)                  # int32 prefetch table
    kbase = jnp.asarray(kbase_np)                      # int32 prefetch table
    col_idx = jnp.asarray(col_idx_np)                  # int32 un-permute gather

    fwd = jax.jit(cube2equi_forward, static_argnames=("out_hw", "k_blk"))
    out = fwd(input_data, M_banded, face_id, kbase, col_idx,
              out_hw=(H, W), k_blk=k_blk)
    out = jax.block_until_ready(out)
    assert out.shape == (B, C, H, W) and out.dtype == jnp.float32

    # Pure-numpy reference of the same banded bf16 resample (validates the
    # face grouping, K banding, scalar-prefetch indexing and the un-permute).
    n_tiles, K_band, _ = M_np.shape
    x_np = np.asarray(input_data, np.float32)
    cube_np = x_np.transpose(1, 0, 2, 3, 4).reshape(6, B * C, w * w)
    cube_bf = np.asarray(
        jnp.asarray(cube_np).astype(jnp.bfloat16).astype(jnp.float32))
    M_bf = np.asarray(
        jnp.asarray(M_np).astype(jnp.bfloat16).astype(jnp.float32))
    ref_padded = np.zeros((B * C, n_tiles * tile_n), np.float32)
    for t in range(n_tiles):
        f = int(face_id_np[t])
        base = int(kbase_np[t]) * k_blk
        ref_padded[:, t * tile_n:(t + 1) * tile_n] = (
            cube_bf[f][:, base:base + K_band] @ M_bf[t])
    ref = ref_padded[:, col_idx_np].reshape(B, C, H, W)
    np.testing.assert_allclose(np.asarray(out), ref, atol=2e-2, rtol=0)

    print("KERNEL_OK")
</pallas_src>

<mosaic_0001>
module attributes {stable_mosaic.version = 11 : i64} {
  func.func private @main(%arg0: i32) attributes {dimension_semantics = [#tpu.dimension_semantics<core_parallel>], iteration_bounds = array<i64: 2>, tpu.core_type = #tpu.core_type<sc_scalar_subcore>, window_params = []} {
    return
  }
}

module attributes {stable_mosaic.version = 11 : i64} {
  func.func private @main(%arg0: i32) attributes {dimension_semantics = [#tpu.dimension_semantics<core_parallel>], iteration_bounds = array<i64: 2>, tpu.core_type = #tpu.core_type<sc_scalar_subcore>, window_params = []} {
    return
  }
}

module attributes {stable_mosaic.version = 11 : i64} {
  func.func @_c2e_kernel(%arg0: i32, %arg1: i32, %arg2: memref<18xi32, #tpu.memory_space<smem>>, %arg3: memref<18xi32, #tpu.memory_space<smem>>, %arg4: memref<1x8x128xbf16, #tpu.memory_space<vmem>>, %arg5: memref<1x128x128xbf16, #tpu.memory_space<vmem>>, %arg6: memref<8x128xf32, #tpu.memory_space<vmem>>, %arg7: memref<8x128xf32, #tpu.memory_space<vmem>>) attributes {dimension_semantics = [#tpu.dimension_semantics<parallel>, #tpu.dimension_semantics<arbitrary>], iteration_bounds = array<i64: 18, 2>, scalar_prefetch = 2 : i64, scratch_operands = 1 : i64, tpu.core_type = #tpu.core_type<tc>, window_params = [{transform_indices = @transform_0, window_bounds = array<i64: 1, 8, 128>}, {transform_indices = @transform_1, window_bounds = array<i64: 1, 128, 128>}, {transform_indices = @transform_2, window_bounds = array<i64: 8, 128>}]} {
    %c0_i32 = arith.constant 0 : i32
    %0 = arith.cmpi eq, %arg1, %c0_i32 : i32
    %1 = arith.extui %0 : i1 to i32
    %c0_i32_0 = arith.constant 0 : i32
    %2 = arith.cmpi ne, %1, %c0_i32_0 : i32
    scf.if %2 {
      %cst_11 = arith.constant 0.000000e+00 : f32
      %14 = vector.broadcast %cst_11 : f32 to vector<8x128xf32>
      %c0_12 = arith.constant 0 : index
      %c0_13 = arith.constant 0 : index
      %15 = vector.load %arg7[%c0_12, %c0_13] : memref<8x128xf32, #tpu.memory_space<vmem>>, vector<8x128xf32>
      tpu.vector_store %arg7[%c0_12, %c0_13], %14 {strides = array<i32>} : memref<8x128xf32, #tpu.memory_space<vmem>>, vector<8x128xf32>,
    } else {
    }
    %c0 = arith.constant 0 : index
    %c0_1 = arith.constant 0 : index
    %3 = vector.load %arg7[%c0, %c0_1] : memref<8x128xf32, #tpu.memory_space<vmem>>, vector<8x128xf32>
    %c0_2 = arith.constant 0 : index
    %c0_3 = arith.constant 0 : index
    %c0_4 = arith.constant 0 : index
    %4 = vector.load %arg4[%c0_2, %c0_3, %c0_4] : memref<1x8x128xbf16, #tpu.memory_space<vmem>>, vector<1x8x128xbf16>
    %5 = vector.shape_cast %4 : vector<1x8x128xbf16> to vector<8x128xbf16>
    %c0_5 = arith.constant 0 : index
    %c0_6 = arith.constant 0 : index
    %c0_7 = arith.constant 0 : index
    %6 = vector.load %arg5[%c0_5, %c0_6, %c0_7] : memref<1x128x128xbf16, #tpu.memory_space<vmem>>, vector<1x128x128xbf16>
    %7 = vector.shape_cast %6 : vector<1x128x128xbf16> to vector<128x128xbf16>
    %cst = arith.constant dense<0.000000e+00> : vector<8x128xf32>
    %8 = tpu.matmul %5, %7, %cst {dimension_numbers = #tpu.dot_dimension_numbers<[1], [0], [0], [1], [0, 0, 1, 1], [], []>} : vector<8x128xbf16>, vector<128x128xbf16>, vector<8x128xf32> -> vector<8x128xf32>
    %9 = arith.addf %3, %8 : vector<8x128xf32>
    %c0_8 = arith.constant 0 : index
    %c0_9 = arith.constant 0 : index
    %10 = vector.load %arg7[%c0_8, %c0_9] : memref<8x128xf32, #tpu.memory_space<vmem>>, vector<8x128xf32>
    tpu.vector_store %arg7[%c0_8, %c0_9], %9 {strides = array<i32>} : memref<8x128xf32, #tpu.memory_space<vmem>>, vector<8x128xf32>,
    %c1_i32 = arith.constant 1 : i32
    %11 = arith.cmpi eq, %arg1, %c1_i32 : i32
    %12 = arith.extui %11 : i1 to i32
    %c0_i32_10 = arith.constant 0 : i32
    %13 = arith.cmpi ne, %12, %c0_i32_10 : i32
    scf.if %13 {
      %c0_11 = arith.constant 0 : index
      %c0_12 = arith.constant 0 : index
      %14 = vector.load %arg7[%c0_11, %c0_12] : memref<8x128xf32, #tpu.memory_space<vmem>>, vector<8x128xf32>
      %c0_13 = arith.constant 0 : index
      %c0_14 = arith.constant 0 : index
      %15 = vector.load %arg6[%c0_13, %c0_14] : memref<8x128xf32, #tpu.memory_space<vmem>>, vector<8x128xf32>
      tpu.vector_store %arg6[%c0_13, %c0_14], %14 {strides = array<i32>} : memref<8x128xf32, #tpu.memory_space<vmem>>, vector<8x128xf32>,
    } else {
    }
    return
  }
  func.func @transform_0(%arg0: i32, %arg1: i32, %arg2: memref<18xi32, #tpu.memory_space<smem>>, %arg3: memref<18xi32, #tpu.memory_space<smem>>) -> (i32, i32, i32) {
    %0 = arith.index_cast %arg0 : i32 to index
    %1 = memref.load %arg2[%0] : memref<18xi32, #tpu.memory_space<smem>>
    %2 = arith.index_cast %arg0 : i32 to index
    %3 = memref.load %arg3[%2] : memref<18xi32, #tpu.memory_space<smem>>
    %4 = arith.addi %3, %arg1 : i32
    %c0_i32 = arith.constant 0 : i32
    %c0_i32_0 = arith.constant 0 : i32
    return %1, %c0_i32, %4 : i32, i32, i32
  }
  func.func @transform_1(%arg0: i32, %arg1: i32, %arg2: memref<18xi32, #tpu.memory_space<smem>>, %arg3: memref<18xi32, #tpu.memory_space<smem>>) -> (i32, i32, i32) {
    %c0_i32 = arith.constant 0 : i32
    %c0_i32_0 = arith.constant 0 : i32
    return %arg0, %arg1, %c0_i32 : i32, i32, i32
  }
  func.func @transform_2(%arg0: i32, %arg1: i32, %arg2: memref<18xi32, #tpu.memory_space<smem>>, %arg3: memref<18xi32, #tpu.memory_space<smem>>) -> (i32, i32) {
    %c0_i32 = arith.constant 0 : i32
    %c0_i32_0 = arith.constant 0 : i32
    return %c0_i32, %arg0 : i32, i32
  }
}

</mosaic_0001>

<bundles_post_ra>
// kernel: cube2equi_forward.1
= control target key start
LH: loop header
LB: loop body
LE: loop exit
PB: predicated region body
PF: predicated region fallthrough
CT: control target
= control target key end

     0   :  { %s725_s0 = inlined_call_operand.vmem [shape: s32[18], index: 0, kind: input, shape index: {}]   ;;  %s726_s2 = inlined_call_operand.vmem [shape: bf16[6,8,256], index: 2, kind: input, shape index: {}]   ;;  %s727_s3 = inlined_call_operand.vmem [shape: bf16[18,256,128], index: 3, kind: input, shape index: {}]   ;;  %s728_s4 = inlined_call_operand.vmem [shape: f32[8,2304], index: 4, kind: output, shape index: {}]   ;;  %s729_s1 = inlined_call_operand.vmem [shape: s32[18], index: 1, kind: input, shape index: {}]  }
   0x1   :  { %s9_s17 = sshll.u32 %s725_s0, 4  ;;  %s13_s20 = sshll.u32 %s729_s1, 4  ;;  %s10_s17 = int_to_ptr.vmem [resolvable:$true] %s9_s17  ;;  %s14_s20 = int_to_ptr.vmem [resolvable:$true] %s13_s20 }
   0x2   :  { %s547_s21 = scalar_lea.vmem %s10_s17, 16  ;;  %p552_p1 = scmp.lt.s32.totalorder %s10_s17, %s10_s17 }
   0x3   :  { %p548_p0 = scmp.ne.s32.totalorder %s10_s17, %s547_s21  ;;  %p553_p2 = scmp.lt.s32.totalorder %s547_s21, %s547_s21 }
   0x5   :  { %p554_p3 = por %p553_p2, %p552_p1 }
   0x7   :  { %p555_p4 = pnand %p554_p3, %p548_p0 }
   0x9   :  { %558 = shalt.err (!%p555_p4)  }
   0xa   :  { %s613_s22 = smov [#allocation4]   ;;  %s559_s23 = scalar_lea.vmem %s14_s20, 16 }
   0xb   :  { %12 = dma.vmem_to_smem %s10_s17, 16, %s613_s22, [#allocation3] }
   0xc   :  { %p560_p5 = scmp.ne.s32.totalorder %s14_s20, %s559_s23  ;;  %p564_p6 = scmp.lt.s32.totalorder %s14_s20, %s14_s20 }
   0xd   :  { %p565_p7 = scmp.lt.s32.totalorder %s559_s23, %s559_s23 }
   0xf   :  { %p566_p8 = por %p565_p7, %p564_p6 }
  0x11   :  { %p567_p9 = pnand %p566_p8, %p560_p5 }
  0x13   :  { %570 = shalt.err (!%p567_p9)  }
  0x14   :  { %s614_s0 = smov [#allocation5]  }
  0x15   :  { %16 = dma.vmem_to_smem %s14_s20, 16, %s614_s0, [#allocation3] }
  0x16   :  { %591 = dma.done.wait [#allocation3], 32 }
  0x17   :  { %592 = vsyncadd [#allocation3], 4294967264 }
  0x18   :  { %18 = sfence }
  0x19   :  { %s649_s1 = smov 0   ;;  %s651_s24 = smov 0  }
  0x1a   :  { %s653_s25 = smov 0   ;;  %s655_s26 = smov 0  }
  0x1b   :  { %s657_s27 = smov 0  }
  0x1c LB: > { %s33_s28 = sadd.s32 1, %s603_s25  ;;  %s36_s29 = sadd.s32 1, %s607_s26  ;;  %s611_s27 = sphi %s657_s27, %s24_s27   ;;  %s607_s26 = sphi %s655_s26, %s733_s26   ;;  %s603_s25 = sphi %s653_s25, %s732_s25   ;;  %s599_s24 = sphi %s651_s24, %s731_s24   ;;  %s595_s1 = sphi %s649_s1, %s730_s1  }
  0x1d   : > { %p34_p10 = scmp.ge.s32.totalorder %s33_s28, 2  ;;  %p446_p11 = scmp.ge.s32.totalorder %s611_s27, 1 }
  0x1e   : > { %p170_p12 = scmp.lt.s32.totalorder %s611_s27, 37 }
  0x1f   : > { %s735_s28 = smov (%p34_p10, %s33_s28), 0  ;;  %s737_s29 = smov (!%p34_p10, %s36_s29), %s607_s26 }
  0x20   : > { %p171_p13 = pnand %p446_p11, %p170_p12  ;;  %p38_p0 = scmp.ge.s32.totalorder %s737_s29, 18 }
  0x21   : > { %s206_s30 = sld [smem:[#allocation4 + %s599_s24]] (!%p171_p13)  ;;  %s449_s6 = sshll.u32 (!%p171_p13), %s595_s1, 4 }
  0x22   : > { %s739_s29 = smov (%p38_p0, %s737_s29), 0  ;;  %174 = sbr.rel (%p171_p13) target bundleno = 311 (0x137), region = 28 }
  0x23   : > { %s207_s5 = sld [smem:[#allocation5 + %s599_s24]] (!%p171_p13)  ;;  %p221_p1 = scmp.lt.s32.totalorder (!%p171_p13), %s599_s24, 17 }
  0x24   : > { %p223_p2 = scmp.lt.s32.totalorder (!%p171_p13), %s449_s6, 31  ;;  %p453_p5 = scmp.ne.s32.totalorder (!%p171_p13), %s595_s1, 0 }
  0x27   : > { %p209_p3 = scmp.lt.s32.totalorder (!%p171_p13), %s206_s30, 5 }
  0x29   : > { %s741_s24 = smov (!%p221_p1, %s599_s24), 17  ;;  %s743_s6 = smov (!%p223_p2, %s449_s6), 31 }
  0x2a   : > { %s450_s7 = sshll.u32 %s741_s24, 5  ;;  %s452_s8 = sshll.u32 %s741_s24, 3  ;;  %v615_v0 = vmov (!%p453_p5), 0.0  }
  0x2b   : > { %s208_s9 = sadd.s32 %s595_s1, %s207_s5  ;;  %s226_s10 = sadd.s32 %s450_s7, %s743_s6  ;;  %239 = vst [vmem:[#allocation2] sm:$0xff] (!%p453_p5), %v615_v0 }
  0x2c   : > { %p211_p4 = scmp.lt.s32.totalorder %s208_s9, 1  ;;  %s745_s30 = smov (!%p209_p3, %s206_s30), 5 }
  0x2d   : > { %s447_s11 = sshll.u32 %s745_s30, 1  ;;  %s451_s12 = sshll.u32 %s226_s10, 2 }
  0x2e   : > { %s747_s9 = smov (!%p211_p4, %s208_s9), 1  ;;  %s686_s16 = scalar_lea.vmem %s727_s3, %s451_s12 }
  0x2f   : > { %s214_s13 = sadd.s32 %s447_s11, %s747_s9  ;;  %s691_s20 = scalar_lea.vmem %s728_s4, %s452_s8 }
  0x30   : > { %s448_s17 = sshll.u32 %s214_s13, 2  ;;  %238 = sbr.rel (%p453_p5) target bundleno = 55 (0x37), region = 32 }
  0x31   : > { %s696_s23 = scalar_lea.vmem %s726_s2, %s448_s17 }
  0x37 PF: > { %v539_v1 = vld [vmem:[%s686_s16] sm:$0xff]   ;;  %v616_v2 = vmov 0.0   ;;  %v540_v3 = vld [vmem:[%s686_s16 + $0x8] sm:$0xff]   ;;  %vm617_vm0 = vmmov 0   ;;  %v541_v4 = vld [vmem:[%s686_s16 + $0x10] sm:$0xff]   ;;  %p462_p6 = scmp.ne.s32.totalorder %s595_s1, 1 }
  0x38   : > { %474 = vmatprep.subr.bf16.mxu0 %v616_v2  ;;  %490 = vmatprep.mubr.msk.bf16.mxu0 %vm617_vm0, %v616_v2  ;;  %v542_v5 = vld [vmem:[%s686_s16 + $0x18] sm:$0xff]   ;;  %v543_v6 = vld [vmem:[%s686_s16 + $0x20] sm:$0xff]   ;;  %v544_v7 = vld [vmem:[%s686_s16 + $0x28] sm:$0xff]  }
  0x39   : > { %475 = vmatpush3.bf16.msra.mxu0 %v539_v1  ;;  %v545_v8 = vld [vmem:[%s686_s16 + $0x30] sm:$0xff]   ;;  %v546_v9 = vld [vmem:[%s686_s16 + $0x38] sm:$0xff]   ;;  %v241_v10 = vld [vmem:[%s696_s23] sm:$0xf] }
  0x3a   : > { %476 = vmatprep.subr.bf16.mxu0 %v616_v2  ;;  %v240_v11 = vld [vmem:[#allocation2] sm:$0xff] }
  0x3d   : > { %477 = vmatpush3.bf16.msra.mxu0 %v540_v3 }
  0x3e   : > { %478 = vmatprep.subr.bf16.mxu0 %v616_v2 }
  0x41   : > { %479 = vmatpush3.bf16.msra.mxu0 %v541_v4 }
  0x42   : > { %480 = vmatprep.subr.bf16.mxu0 %v616_v2 }
  0x45   : > { %481 = vmatpush3.bf16.msra.mxu0 %v542_v5 }
  0x46   : > { %482 = vmatprep.subr.bf16.mxu0 %v616_v2 }
  0x49   : > { %483 = vmatpush3.bf16.msra.mxu0 %v543_v6 }
  0x4a   : > { %484 = vmatprep.subr.bf16.mxu0 %v616_v2 }
  0x4d   : > { %485 = vmatpush3.bf16.msra.mxu0 %v544_v7 }
  0x4e   : > { %486 = vmatprep.subr.bf16.mxu0 %v616_v2 }
  0x51   : > { %487 = vmatpush3.bf16.msra.mxu0 %v545_v8 }
  0x52   : > { %488 = vmatprep.subr.bf16.mxu0 %v616_v2 }
  0x55   : > { %489 = vmatpush3.bf16.msra.mxu0 %v546_v9 }
  0x58   : > { %491 = vmatmul.mubr.bf16.vlgmr.msra.gmra.mrb[0].mxu0 %v241_v10 }
 0x128   : > { %351 = sbr.rel (%p462_p6) target bundleno = 311 (0x137), region = 36 }
 0x12b   : > { %v340_v12 = vpop.f32.mrb[0].mxu0 }
 0x12c   : > { %v346_v13 = vadd.f32 %v340_v12, %v240_v11  ;;  %v492_v14 = vpop.f32.mrb[1].mxu0 }
 0x12d   : > { %v343_v15 = vpop.f32.mrb[2].mxu0 }
 0x12e   : > { %347 = vst [vmem:[#allocation2] sm:$0xff] %v346_v13  ;;  %v493_v16 = vpop.f32.mrb[3].mxu0 }
 0x135   : > { %v352_v17 = vld [vmem:[#allocation2] sm:$0xff] }
 0x136   : > { %353 = vst [vmem:[%s691_s20] sm:$0xff] %v352_v17 }
 0x137 PF: > { %s24_s27 = sadd.s32 1, %s611_s27   ;;  %s730_s1 = smov %s603_s25 }
 0x138   : > { %p21_p7 = scmp.ge.s32.totalorder %s24_s27, 38   ;;  %s731_s24 = smov %s607_s26 }
 0x139   : > { %s732_s25 = smov %s735_s28  ;;  %s733_s26 = smov %s739_s29 }
 0x13a   :  { %23 = sbr.rel (!%p21_p7) target bundleno = 28 (0x1c), region = 69 }

</bundles_post_ra>
